<compile_context>
chip_gen: v6e
topology: v6e:2x2x1
jax: 0.10.0
libtpu: 0.0.40
codegen_flags: <defaults>
</compile_context>

<pallas_src>
import math

import numpy as np
import jax
import jax.numpy as jnp
from jax.experimental import pallas as pl
from jax.experimental.pallas import tpu as pltpu

P = 2        # number of input features (matches the PyTorch module's `p`)
LANES = 128  # vreg lane width


def regression_kernel(params_ref, x_ref, o_ref):
    # params_ref: (4,) SMEM   = [w0, w1, bias, factor]   (scalar reads)
    # x_ref:      (P, TILE_ROWS, 128) VMEM, feature-major, fully dense vregs
    # o_ref:      (TILE_ROWS, 128)    VMEM, lane-dense output (unmasked vst)
    w0 = params_ref[0]
    w1 = params_ref[1]
    b = params_ref[2]
    f = params_ref[3]

    x0 = x_ref[0]   # (TILE_ROWS, 128)
    x1 = x_ref[1]   # (TILE_ROWS, 128)

    # Linear term (pure VPU, no MXU round-trip) + interaction term.
    lin = w0 * x0 + w1 * x1 + b
    inter = (f * x0) * x1
    o_ref[...] = (lin + inter).astype(o_ref.dtype)


def regression_forward(x, weight, bias, factor, *, tile_rows=2048):
    """x: (N, P) f32, weight: (1, P) f32, bias: scalar f32, factor: scalar f32.

    Returns y: (N, 1) f32 — identical semantics to the PyTorch module.
    tile_rows: batch rows of 128 samples per grid step (sweep per generation;
    2048 is safe for v5e's 16 MiB scoped VMEM default and good on v6e/v7x).
    """
    n, p_in = x.shape
    assert p_in == P, f"expected {P} features, got {p_in}"

    n_rows = -(-n // LANES)                      # ceil(N / 128)
    tile_rows = max(1, min(tile_rows, n_rows))
    n_rows_pad = -(-n_rows // tile_rows) * tile_rows
    n_pad = n_rows_pad * LANES

    x32 = x.astype(jnp.float32)
    if n_pad != n:
        x32 = jnp.pad(x32, ((0, n_pad - n), (0, 0)))

    # Feature-major, sublane+lane dense view: (P, n_rows_pad, 128).
    # Single fused XLA reshape+transpose (one extra HBM pass over x).
    x_fm = jnp.transpose(x32.reshape(n_rows_pad, LANES, P), (2, 0, 1))

    # Pack all scalars into one SMEM array: [w0, w1, bias, factor].
    params = jnp.concatenate(
        [
            jnp.asarray(weight, jnp.float32).reshape(-1),
            jnp.asarray(bias, jnp.float32).reshape(1),
            jnp.asarray(factor, jnp.float32).reshape(1),
        ]
    )  # (4,)

    y = pl.pallas_call(
        regression_kernel,
        out_shape=jax.ShapeDtypeStruct((n_rows_pad, LANES), jnp.float32),
        grid=(n_rows_pad // tile_rows,),
        in_specs=[
            pl.BlockSpec(memory_space=pltpu.MemorySpace.SMEM),       # params
            pl.BlockSpec((P, tile_rows, LANES), lambda i: (0, i, 0)),  # x tile
        ],
        out_specs=pl.BlockSpec((tile_rows, LANES), lambda i: (i, 0)),  # y tile
        compiler_params=pltpu.CompilerParams(
            dimension_semantics=("parallel",)
        ),
    )(params, x_fm)

    # Back to the PyTorch output convention (N, 1).  When N divides evenly this
    # is a metadata-only reshape (no extra HBM pass).
    y_flat = y.reshape(n_pad, 1)
    if n_pad != n:
        y_flat = y_flat[:n]
    return y_flat


if __name__ == "__main__":
    key = jax.random.PRNGKey(0)
    kx, kw, kb = jax.random.split(key, 3)

    N = 256  # small batch; multiple of 128 so the demo needs no padding/slicing
    x = jax.random.normal(kx, (N, P), dtype=jnp.float32)

    # Deterministic parameter init mimicking nn.Linear's U(-1/sqrt(p), 1/sqrt(p)),
    # plus factor initialized to 1.0 (as in the module's __init__).
    bound = 1.0 / math.sqrt(P)
    weight = jax.random.uniform(kw, (1, P), jnp.float32, minval=-bound, maxval=bound)
    bias = jax.random.uniform(kb, (), jnp.float32, minval=-bound, maxval=bound)
    factor = jnp.float32(1.0)

    y = regression_forward(x, weight, bias, factor)
    y = jax.block_until_ready(y)

    # Pure-JAX reference check.
    y_ref = x @ weight.T + bias + (factor * x[:, 0] * x[:, 1])[:, None]
    assert y.shape == (N, 1)
    np.testing.assert_allclose(np.asarray(y), np.asarray(y_ref), rtol=1e-5, atol=1e-5)

    print("KERNEL_OK")
</pallas_src>

<mosaic_0001>
module attributes {stable_mosaic.version = 11 : i64} {
  func.func @regression_kernel(%arg0: i32, %arg1: memref<4xf32, #tpu.memory_space<smem>>, %arg2: memref<2x2x128xf32, #tpu.memory_space<vmem>>, %arg3: memref<2x128xf32, #tpu.memory_space<vmem>>) attributes {dimension_semantics = [#tpu.dimension_semantics<parallel>], iteration_bounds = array<i64: 1>, scalar_prefetch = 0 : i64, scratch_operands = 0 : i64, tpu.core_type = #tpu.core_type<tc>, window_params = [{transform_indices = @transform_0, window_bounds = array<i64: 4>}, {transform_indices = @transform_1, window_bounds = array<i64: 2, 2, 128>}, {transform_indices = @transform_2, window_bounds = array<i64: 2, 128>}]} {
    %c0 = arith.constant 0 : index
    %0 = memref.load %arg1[%c0] : memref<4xf32, #tpu.memory_space<smem>>
    %c1 = arith.constant 1 : index
    %1 = memref.load %arg1[%c1] : memref<4xf32, #tpu.memory_space<smem>>
    %c2 = arith.constant 2 : index
    %2 = memref.load %arg1[%c2] : memref<4xf32, #tpu.memory_space<smem>>
    %c3 = arith.constant 3 : index
    %3 = memref.load %arg1[%c3] : memref<4xf32, #tpu.memory_space<smem>>
    %c0_0 = arith.constant 0 : index
    %c0_1 = arith.constant 0 : index
    %c0_2 = arith.constant 0 : index
    %4 = vector.load %arg2[%c0_0, %c0_1, %c0_2] : memref<2x2x128xf32, #tpu.memory_space<vmem>>, vector<1x2x128xf32>
    %5 = vector.shape_cast %4 : vector<1x2x128xf32> to vector<2x128xf32>
    %c1_3 = arith.constant 1 : index
    %c0_4 = arith.constant 0 : index
    %c0_5 = arith.constant 0 : index
    %6 = vector.load %arg2[%c1_3, %c0_4, %c0_5] : memref<2x2x128xf32, #tpu.memory_space<vmem>>, vector<1x2x128xf32>
    %7 = vector.shape_cast %6 : vector<1x2x128xf32> to vector<2x128xf32>
    %8 = vector.broadcast %0 : f32 to vector<2x128xf32>
    %9 = arith.mulf %8, %5 : vector<2x128xf32>
    %10 = vector.broadcast %1 : f32 to vector<2x128xf32>
    %11 = arith.mulf %10, %7 : vector<2x128xf32>
    %12 = arith.addf %9, %11 : vector<2x128xf32>
    %13 = vector.broadcast %2 : f32 to vector<2x128xf32>
    %14 = arith.addf %12, %13 : vector<2x128xf32>
    %15 = vector.broadcast %3 : f32 to vector<2x128xf32>
    %16 = arith.mulf %15, %5 : vector<2x128xf32>
    %17 = arith.mulf %16, %7 : vector<2x128xf32>
    %18 = arith.addf %14, %17 : vector<2x128xf32>
    %c0_6 = arith.constant 0 : index
    %c0_7 = arith.constant 0 : index
    %19 = vector.load %arg3[%c0_6, %c0_7] : memref<2x128xf32, #tpu.memory_space<vmem>>, vector<2x128xf32>
    tpu.vector_store %arg3[%c0_6, %c0_7], %18 {strides = array<i32>} : memref<2x128xf32, #tpu.memory_space<vmem>>, vector<2x128xf32>,
    return
  }
  func.func @transform_0(%arg0: i32) -> i32 {
    %c0_i32 = arith.constant 0 : i32
    %c0_i32_0 = arith.constant 0 : i32
    return %c0_i32 : i32
  }
  func.func @transform_1(%arg0: i32) -> (i32, i32, i32) {
    %c0_i32 = arith.constant 0 : i32
    %c0_i32_0 = arith.constant 0 : i32
    %c0_i32_1 = arith.constant 0 : i32
    return %c0_i32, %arg0, %c0_i32_0 : i32, i32, i32
  }
  func.func @transform_2(%arg0: i32) -> (i32, i32) {
    %c0_i32 = arith.constant 0 : i32
    %c0_i32_0 = arith.constant 0 : i32
    return %arg0, %c0_i32 : i32, i32
  }
}

</mosaic_0001>

<bundles_post_ra>
// kernel: tpu_custom_call.1
= control target key start
LH: loop header
LB: loop body
LE: loop exit
PB: predicated region body
PF: predicated region fallthrough
CT: control target
= control target key end

     0   :  { %7 = vsyncpa [#allocation5], 0  ;;  %s163_s0 = inlined_call_operand.hbm [shape: f32[4], index: 0, kind: input, shape index: {}]   ;;  %s164_s1 = inlined_call_operand.hbm [shape: f32[2,2,128], index: 1, kind: input, shape index: {}]   ;;  %s165_s2 = inlined_call_operand.hbm [shape: f32[2,128], index: 2, kind: output, shape index: {}]  }
   0x1   :  { %8 = vsyncpa [#allocation3], 0 }
   0x2   :  { %9 = vsyncpa [#allocation4], 0  ;;  %s134_s9 = smov [#allocation2]   ;;  %s135_s12 = smov [#allocation6]  }
   0x3   :  { %17 = dma.hbm_to_smem %s163_s0, 16, %s134_s9, [#allocation5]  }
   0x4   :  { %s23_s13 = sshll.u32 %s135_s12, 4  ;;  %s24_s13 = int_to_ptr.vmem [resolvable:$true] %s23_s13 }
   0x5   :  { %s96_s14 = scalar_lea.vmem %s24_s13, 64  ;;  %p101_p1 = scmp.lt.s32.totalorder %s24_s13, %s24_s13 }
   0x6   :  { %p97_p0 = scmp.ne.s32.totalorder %s24_s13, %s96_s14  ;;  %p102_p2 = scmp.lt.s32.totalorder %s96_s14, %s96_s14 }
   0x8   :  { %p103_p3 = por %p102_p2, %p101_p1 }
   0xa   :  { %p104_p4 = pnand %p103_p3, %p97_p0 }
   0xc   :  { %107 = shalt.err (!%p104_p4)
}
   0xd   :  { %s136_s15 = smov 32   ;;  %s137_s16 = smov 2  }
   0xe   :  { %29 = dma.hbm_to_vmem [thread:$0]  %s164_s1, 64, %s24_s13, [#allocation3], %s136_s15, %s136_s15, %s137_s16  }
   0xf   :  { %128 = dma.done.wait [#allocation5], 16  }
  0x10   :  { %129 = vsyncadd [#allocation5], 4294967280 }
  0x11   :  { %130 = dma.done.wait [#allocation3], 64  }
  0x12   :  { %131 = vsyncadd [#allocation3], 4294967232 }
  0x13   :  { %36 = sfence }
  0x14   :  { %s37_s0 = sld [smem:[#allocation2]]  ;;  %v41_v0 = vld [vmem:[#allocation6] sm:$0x3]  ;;  %v43_v1 = vld [vmem:[#allocation6 + $0x2] sm:$0x3]  ;;  %s138_s1 = smov [#allocation7]  }
  0x15   :  { %s72_s19 = sld [smem:[#allocation2 + $0x1]]  ;;  %s62_s22 = sshll.u32 %s138_s1, 4  ;;  %s63_s22 = int_to_ptr.vmem [resolvable:$true] %s62_s22 }
  0x16   :  { %s73_s20 = sld [smem:[#allocation2 + $0x2]]  ;;  %s108_s23 = scalar_lea.vmem %s63_s22, 32 }
  0x17   :  { %s74_s21 = sld [smem:[#allocation2 + $0x3]]  ;;  %p109_p5 = scmp.ne.s32.totalorder %s63_s22, %s108_s23 }
  0x18   :  { %p113_p6 = scmp.lt.s32.totalorder %s63_s22, %s63_s22  ;;  %p114_p7 = scmp.lt.s32.totalorder %s108_s23, %s108_s23 }
  0x1a   :  { %v44_v2 = vstv %s37_s0  ;;  %p115_p8 = por %p114_p7, %p113_p6 }
  0x1b   :  { %v45_v3 = vmul.f32 %v44_v2, %v41_v0  ;;  %v46_v4 = vstv %s72_s19 }
  0x1c   :  { %v47_v5 = vmul.f32 %v46_v4, %v43_v1  ;;  %v49_v6 = vstv %s73_s20  ;;  %p116_p9 = pnand %p115_p8, %p109_p5 }
  0x1d   :  { %v51_v7 = vstv %s74_s21 }
  0x1e   :  { %v48_v8 = vadd.f32 %v47_v5, %v45_v3  ;;  %v52_v9 = vmul.f32 %v51_v7, %v41_v0 }
  0x20   :  { %v50_v10 = vadd.f32 %v49_v6, %v48_v8  ;;  %v53_v11 = vmul.f32 %v52_v9, %v43_v1 }
  0x22   :  { %v54_v12 = vadd.f32 %v53_v11, %v50_v10 }
  0x24   :  { %55 = vst [vmem:[#allocation7] sm:$0x3] %v54_v12 }
  0x25   :  { %119 = shalt.err (!%p116_p9)
}
  0x26   :  { %65 = dma.vmem_to_hbm [thread:$0]  %s63_s22, 32, %s165_s2, [#allocation4]  }
  0x27   :  { %132 = dma.done.wait [#allocation4], 32  }
  0x28   :  { %133 = vsyncadd [#allocation4], 4294967264 }
  0x29   :  { %69 = vsyncpa [#allocation3], 1 }
  0x2a   :  { %70 = vsyncpa [#allocation4], 1 }
  0x2b   :  { %71 = vsyncpa [#allocation5], 1 }

</bundles_post_ra>
